<compile_context>
chip_gen: v7x
topology: tpu7x:2x2x1
jax: 0.10.0
libtpu: 0.0.40
codegen_flags: <defaults>
</compile_context>

<pallas_src>
import functools

import jax
import jax.numpy as jnp
from jax.experimental import pallas as pl
from jax.experimental.pallas import tpu as pltpu


# ---------------------------------------------------------------------------
# Small helpers
# ---------------------------------------------------------------------------
def _round_up(x, m):
    return (x + m - 1) // m * m


def _pick_tile(dim, target, align=128):
    """Largest multiple of `align` that divides `dim` and is <= target."""
    assert dim % align == 0, (dim, align)
    t = max(align, (min(target, dim) // align) * align)
    while dim % t != 0:
        t -= align
    return t


def _vmem_limit_bytes():
    """Scoped-VMEM limit: half of physical, capped at 64 MiB.

    -> 64 MiB on v5e/v6e (128 MiB physical), 32 MiB on v7x (64 MiB physical).
    """
    cap = 64 * 1024 * 1024  # conservative default if the query fails
    try:
        cap = int(pltpu.get_tpu_info().vmem_capacity_bytes)
    except Exception:
        pass
    return min(cap // 2, 64 * 1024 * 1024)


_VMEM_LIMIT = _vmem_limit_bytes()


def _pad_cast(x, rows, cols, dtype=jnp.bfloat16):
    """Pad x to (rows, cols) and cast; skips the copy when already aligned."""
    r, c = x.shape
    x = x.astype(dtype)
    if (r, c) == (rows, cols):
        return x
    return jnp.zeros((rows, cols), dtype).at[:r, :c].set(x)


# ---------------------------------------------------------------------------
# Tiled matmul kernel (bf16 inputs, f32 accumulation, optional fused ReLU)
# ---------------------------------------------------------------------------
def _matmul_kernel(a_ref, b_ref, o_ref, acc_ref, *, apply_relu):
    @pl.when(pl.program_id(2) == 0)
    def _():
        acc_ref[...] = jnp.zeros_like(acc_ref)

    acc_ref[...] += jnp.dot(
        a_ref[...], b_ref[...], preferred_element_type=jnp.float32
    )

    @pl.when(pl.program_id(2) == pl.num_programs(2) - 1)
    def _():
        r = acc_ref[...]
        if apply_relu:
            r = jnp.maximum(r, 0.0)
        o_ref[...] = r.astype(o_ref.dtype)


def tiled_matmul_padded(a, b, *, apply_relu=False, out_dtype=jnp.float32,
                        tm=512, tn=256, tk=512):
    """out = a @ b (+optional ReLU) on PRE-PADDED bf16 operands.

    Operands and output stay in their padded, multiple-of-128 shapes — no
    slicing / re-padding between chained calls.
    """
    mp, kp = a.shape
    kp2, np_ = b.shape
    assert kp == kp2, (a.shape, b.shape)
    tm = _pick_tile(mp, tm)
    tn = _pick_tile(np_, tn)
    tk = _pick_tile(kp, tk)

    kernel = functools.partial(_matmul_kernel, apply_relu=apply_relu)
    return pl.pallas_call(
        kernel,
        out_shape=jax.ShapeDtypeStruct((mp, np_), out_dtype),
        grid=(mp // tm, np_ // tn, kp // tk),
        in_specs=[
            pl.BlockSpec((tm, tk), lambda i, j, k: (i, k)),
            pl.BlockSpec((tk, tn), lambda i, j, k: (k, j)),
        ],
        out_specs=pl.BlockSpec((tm, tn), lambda i, j, k: (i, j)),
        scratch_shapes=[pltpu.VMEM((tm, tn), jnp.float32)],
        compiler_params=pltpu.CompilerParams(
            dimension_semantics=("parallel", "parallel", "arbitrary"),
            vmem_limit_bytes=_VMEM_LIMIT,
        ),
    )(a, b)


# ---------------------------------------------------------------------------
# Fused 2-layer GCN encoder (single pallas_call) for small graphs
# ---------------------------------------------------------------------------
def _fused_encoder_kernel(adj_ref, x_ref, w1_ref, w2_ref, z_ref):
    xw1 = jnp.dot(x_ref[...], w1_ref[...], preferred_element_type=jnp.float32)
    h = jnp.dot(adj_ref[...], xw1.astype(jnp.bfloat16),
                preferred_element_type=jnp.float32)
    h = jnp.maximum(h, 0.0).astype(jnp.bfloat16)
    hw2 = jnp.dot(h, w2_ref[...], preferred_element_type=jnp.float32)
    z = jnp.dot(adj_ref[...], hw2.astype(jnp.bfloat16),
                preferred_element_type=jnp.float32)
    z_ref[...] = z.astype(z_ref.dtype)


def _fused_encoder_fits(n, f_in, hidden, latent, budget_bytes):
    np_ = _round_up(n, 128)
    fp, hp, lp = (_round_up(f_in, 128), _round_up(hidden, 128),
                  _round_up(latent, 128))
    # Pipeline-managed buffers (bf16 inputs + f32 output), double-buffered by
    # default even at grid=(1,).
    io = 2 * ((np_ * np_ + np_ * fp + fp * hp + hp * lp) * 2 + np_ * lp * 4)
    # Live f32 intermediates inside the single trace (xw1, h, hw2, z).
    inter = (2 * np_ * hp + 2 * np_ * lp) * 4
    return io + inter < budget_bytes


def encode_fused(adj_p, x_p, w1_p, w2_p):
    """Both GCN layers in one pallas_call; all operands pre-padded bf16."""
    np_, fp = x_p.shape
    hp = w1_p.shape[1]
    lp = w2_p.shape[1]
    return pl.pallas_call(
        _fused_encoder_kernel,
        out_shape=jax.ShapeDtypeStruct((np_, lp), jnp.float32),
        grid=(1,),
        in_specs=[
            pl.BlockSpec((np_, np_), lambda i: (0, 0)),
            pl.BlockSpec((np_, fp), lambda i: (0, 0)),
            pl.BlockSpec((fp, hp), lambda i: (0, 0)),
            pl.BlockSpec((hp, lp), lambda i: (0, 0)),
        ],
        out_specs=pl.BlockSpec((np_, lp), lambda i: (0, 0)),
        compiler_params=pltpu.CompilerParams(
            dimension_semantics=("arbitrary",),
            vmem_limit_bytes=_VMEM_LIMIT,
        ),
    )(adj_p, x_p, w1_p, w2_p)


# ---------------------------------------------------------------------------
# Lane-dense inner-product decoder: out[e] = sigmoid(sum_d z[src[e],d]*z[dst[e],d])
# ---------------------------------------------------------------------------
def _inner_product_kernel(zs_ref, zd_ref, out_ref, *, sigmoid):
    # zs_ref / zd_ref: [Dp, tE] bf16 (edges on the lane axis) -> out_ref: [1, tE]
    prod = zs_ref[...].astype(jnp.float32) * zd_ref[...].astype(jnp.float32)
    logits = jnp.sum(prod, axis=0, keepdims=True)
    if sigmoid:
        logits = jax.nn.sigmoid(logits)
    out_ref[...] = logits.astype(out_ref.dtype)


def inner_product_decode(z, edge_index, *, sigmoid=True, te=2048):
    """InnerProductDecoder.  Gather is glue; multiply/reduce/sigmoid in-kernel."""
    # TODO(synk): fuse the edge gather in-kernel via PrefetchScalarGridSpec +
    # pl.Element row gather; gather stays in plain JAX for small E.
    z_src = z[edge_index[0]]  # [E, D]
    z_dst = z[edge_index[1]]  # [E, D]
    e, d = z_src.shape

    dp = _round_up(d, 16)        # bf16 sublane packing needs 16, not 8
    ep = _round_up(e, 128)
    te = _pick_tile(ep, te)

    # Lane-dense bf16 staging: [D, E] inputs, [1, E] output.
    zs_t = jnp.zeros((dp, ep), jnp.bfloat16).at[:d, :e].set(
        z_src.T.astype(jnp.bfloat16))
    zd_t = jnp.zeros((dp, ep), jnp.bfloat16).at[:d, :e].set(
        z_dst.T.astype(jnp.bfloat16))

    kernel = functools.partial(_inner_product_kernel, sigmoid=sigmoid)
    out = pl.pallas_call(
        kernel,
        out_shape=jax.ShapeDtypeStruct((1, ep), jnp.float32),
        grid=(ep // te,),
        in_specs=[
            pl.BlockSpec((dp, te), lambda i: (0, i)),
            pl.BlockSpec((dp, te), lambda i: (0, i)),
        ],
        out_specs=pl.BlockSpec((1, te), lambda i: (0, i)),
        compiler_params=pltpu.CompilerParams(
            dimension_semantics=("parallel",),
            vmem_limit_bytes=_VMEM_LIMIT,
        ),
    )(zs_t, zd_t)
    return out[0, :e]


# ---------------------------------------------------------------------------
# Plain-JAX glue: adjacency normalization, params, model wrapper
# ---------------------------------------------------------------------------
def normalized_adjacency(edge_index, num_nodes):
    """A_hat = D^{-1/2} (A + I) D^{-1/2}, dense, symmetric (GCN normalization)."""
    a = jnp.zeros((num_nodes, num_nodes), jnp.float32)
    a = a.at[edge_index[0], edge_index[1]].set(1.0)
    a = a.at[edge_index[1], edge_index[0]].set(1.0)
    a = a + jnp.eye(num_nodes, dtype=jnp.float32)
    deg = jnp.sum(a, axis=1)
    d_inv_sqrt = 1.0 / jnp.sqrt(deg)
    return a * d_inv_sqrt[:, None] * d_inv_sqrt[None, :]


class GAE:
    """Pallas-backed GAE: 2-layer GCN encoder + inner-product decoder."""

    def __init__(self, in_features, hidden, latent, key):
        k1, k2 = jax.random.split(key)
        s1 = jnp.sqrt(6.0 / (in_features + hidden))
        s2 = jnp.sqrt(6.0 / (hidden + latent))
        self.w1 = jax.random.uniform(k1, (in_features, hidden), jnp.float32, -s1, s1)
        self.w2 = jax.random.uniform(k2, (hidden, latent), jnp.float32, -s2, s2)

    def encode(self, x, adj_hat, fused=None):
        n = adj_hat.shape[0]
        f_in, hidden = self.w1.shape
        latent = self.w2.shape[1]
        np_ = _round_up(n, 128)
        fp, hp, lp = (_round_up(f_in, 128), _round_up(hidden, 128),
                      _round_up(latent, 128))

        # Pad + bf16-cast ONCE at the model boundary; both GCN layers reuse the
        # same padded adjacency (biggest HBM-traffic saver on large graphs).
        adj_p = _pad_cast(adj_hat, np_, np_)
        x_p = _pad_cast(x, np_, fp)
        w1_p = _pad_cast(self.w1, fp, hp)
        w2_p = _pad_cast(self.w2, hp, lp)

        if fused is None:
            fused = _fused_encoder_fits(n, f_in, hidden, latent,
                                        budget_bytes=(_VMEM_LIMIT * 3) // 4)
        if fused:
            z_p = encode_fused(adj_p, x_p, w1_p, w2_p)
        else:
            # Intermediates stay padded bf16 between layers; slice only once at
            # the very end.
            xw1 = tiled_matmul_padded(x_p, w1_p, out_dtype=jnp.bfloat16)
            h = tiled_matmul_padded(adj_p, xw1, apply_relu=True,
                                    out_dtype=jnp.bfloat16)
            hw2 = tiled_matmul_padded(h, w2_p, out_dtype=jnp.bfloat16)
            z_p = tiled_matmul_padded(adj_p, hw2, out_dtype=jnp.float32)
        return z_p[:n, :latent]

    def forward(self, x, adj_hat):
        """Alias for encode (matches torch GAE.forward)."""
        return self.encode(x, adj_hat)

    def decode(self, z, edge_index, sigmoid=True):
        return inner_product_decode(z, edge_index, sigmoid=sigmoid)

    def recon_loss(self, z, pos_edge_index, neg_edge_index):
        # Numerically stable equivalent of
        #   -log(sigmoid(x) + EPS).mean() - log(1 - sigmoid(x) + EPS).mean():
        # -log(sigmoid(x)) = softplus(-x), -log(1 - sigmoid(x)) = softplus(x).
        pos_logits = self.decode(z, pos_edge_index, sigmoid=False)
        neg_logits = self.decode(z, neg_edge_index, sigmoid=False)
        pos_loss = jnp.mean(jax.nn.softplus(-pos_logits))
        neg_loss = jnp.mean(jax.nn.softplus(neg_logits))
        return pos_loss + neg_loss
        # TODO(synk): negative_sampling (when neg_edge_index is None) is
        # data-dependent rejection sampling with no clean Pallas equivalent;
        # caller must supply negative edges.


# ---------------------------------------------------------------------------
# Demo
# ---------------------------------------------------------------------------
if __name__ == "__main__":
    key = jax.random.PRNGKey(0)
    k_feat, k_param = jax.random.split(key)

    num_nodes = 64
    in_features = 32
    hidden = 32
    latent = 16

    # Deterministic node features.
    x = jax.random.normal(k_feat, (num_nodes, in_features), jnp.float32)

    # Deterministic ring graph edges (src -> dst), E = num_nodes.
    src = jnp.arange(num_nodes, dtype=jnp.int32)
    dst = (src + 1) % num_nodes
    pos_edge_index = jnp.stack([src, dst], axis=0)  # [2, E]
    # "Negative" edges: connect node i to node i + N//2 (not in the ring).
    neg_dst = (src + num_nodes // 2) % num_nodes
    neg_edge_index = jnp.stack([src, neg_dst], axis=0)

    adj_hat = normalized_adjacency(pos_edge_index, num_nodes)

    model = GAE(in_features, hidden, latent, k_param)

    # forward == encode (auto-selects the fused single-kernel path at this size).
    z = jax.block_until_ready(model.forward(x, adj_hat))
    assert z.shape == (num_nodes, latent)
    assert bool(jnp.isfinite(z).all())

    # Tiled (general) path: should match the fused path up to bf16 rounding.
    z_tiled = jax.block_until_ready(model.encode(x, adj_hat, fused=False))
    assert z_tiled.shape == (num_nodes, latent)
    assert bool(jnp.allclose(z, z_tiled, atol=1e-2, rtol=1e-2))

    # decode (default InnerProductDecoder) + recon loss, also Pallas-backed.
    edge_probs = jax.block_until_ready(model.decode(z, pos_edge_index, sigmoid=True))
    assert edge_probs.shape == (num_nodes,)
    assert bool(jnp.isfinite(edge_probs).all())
    assert bool(((edge_probs >= 0.0) & (edge_probs <= 1.0)).all())
    loss = jax.block_until_ready(model.recon_loss(z, pos_edge_index, neg_edge_index))
    assert bool(jnp.isfinite(loss))

    print("KERNEL_OK")
</pallas_src>

<mosaic_0001>
module attributes {stable_mosaic.version = 11 : i64} {
  func.func @_fused_encoder_kernel(%arg0: i32, %arg1: memref<128x128xbf16, #tpu.memory_space<vmem>>, %arg2: memref<128x128xbf16, #tpu.memory_space<vmem>>, %arg3: memref<128x128xbf16, #tpu.memory_space<vmem>>, %arg4: memref<128x128xbf16, #tpu.memory_space<vmem>>, %arg5: memref<128x128xf32, #tpu.memory_space<vmem>>) attributes {dimension_semantics = [#tpu.dimension_semantics<arbitrary>], iteration_bounds = array<i64: 1>, scalar_prefetch = 0 : i64, scratch_operands = 0 : i64, tpu.core_type = #tpu.core_type<tc>, window_params = [{pipeline_mode = #tpu.pipeline_mode<synchronous>, transform_indices = @transform_0, window_bounds = array<i64: 128, 128>}, {pipeline_mode = #tpu.pipeline_mode<synchronous>, transform_indices = @transform_1, window_bounds = array<i64: 128, 128>}, {pipeline_mode = #tpu.pipeline_mode<synchronous>, transform_indices = @transform_2, window_bounds = array<i64: 128, 128>}, {pipeline_mode = #tpu.pipeline_mode<synchronous>, transform_indices = @transform_3, window_bounds = array<i64: 128, 128>}, {pipeline_mode = #tpu.pipeline_mode<synchronous>, transform_indices = @transform_4, window_bounds = array<i64: 128, 128>}]} {
    %c0 = arith.constant 0 : index
    %c0_0 = arith.constant 0 : index
    %0 = vector.load %arg2[%c0, %c0_0] : memref<128x128xbf16, #tpu.memory_space<vmem>>, vector<128x128xbf16>
    %c0_1 = arith.constant 0 : index
    %c0_2 = arith.constant 0 : index
    %1 = vector.load %arg3[%c0_1, %c0_2] : memref<128x128xbf16, #tpu.memory_space<vmem>>, vector<128x128xbf16>
    %cst = arith.constant dense<0.000000e+00> : vector<128x128xf32>
    %2 = tpu.matmul %0, %1, %cst {dimension_numbers = #tpu.dot_dimension_numbers<[1], [0], [0], [1], [0, 0, 1, 1], [], []>} : vector<128x128xbf16>, vector<128x128xbf16>, vector<128x128xf32> -> vector<128x128xf32>
    %c0_3 = arith.constant 0 : index
    %c0_4 = arith.constant 0 : index
    %3 = vector.load %arg1[%c0_3, %c0_4] : memref<128x128xbf16, #tpu.memory_space<vmem>>, vector<128x128xbf16>
    %4 = arith.truncf %2 : vector<128x128xf32> to vector<128x128xbf16>
    %cst_5 = arith.constant dense<0.000000e+00> : vector<128x128xf32>
    %5 = tpu.matmul %3, %4, %cst_5 {dimension_numbers = #tpu.dot_dimension_numbers<[1], [0], [0], [1], [0, 0, 1, 1], [], []>} : vector<128x128xbf16>, vector<128x128xbf16>, vector<128x128xf32> -> vector<128x128xf32>
    %cst_6 = arith.constant 0.000000e+00 : f32
    %6 = vector.broadcast %cst_6 : f32 to vector<128x128xf32>
    %7 = arith.maximumf %5, %6 : vector<128x128xf32>
    %8 = arith.truncf %7 : vector<128x128xf32> to vector<128x128xbf16>
    %c0_7 = arith.constant 0 : index
    %c0_8 = arith.constant 0 : index
    %9 = vector.load %arg4[%c0_7, %c0_8] : memref<128x128xbf16, #tpu.memory_space<vmem>>, vector<128x128xbf16>
    %cst_9 = arith.constant dense<0.000000e+00> : vector<128x128xf32>
    %10 = tpu.matmul %8, %9, %cst_9 {dimension_numbers = #tpu.dot_dimension_numbers<[1], [0], [0], [1], [0, 0, 1, 1], [], []>} : vector<128x128xbf16>, vector<128x128xbf16>, vector<128x128xf32> -> vector<128x128xf32>
    %c0_10 = arith.constant 0 : index
    %c0_11 = arith.constant 0 : index
    %11 = vector.load %arg1[%c0_10, %c0_11] : memref<128x128xbf16, #tpu.memory_space<vmem>>, vector<128x128xbf16>
    %12 = arith.truncf %10 : vector<128x128xf32> to vector<128x128xbf16>
    %cst_12 = arith.constant dense<0.000000e+00> : vector<128x128xf32>
    %13 = tpu.matmul %11, %12, %cst_12 {dimension_numbers = #tpu.dot_dimension_numbers<[1], [0], [0], [1], [0, 0, 1, 1], [], []>} : vector<128x128xbf16>, vector<128x128xbf16>, vector<128x128xf32> -> vector<128x128xf32>
    %c0_13 = arith.constant 0 : index
    %c0_14 = arith.constant 0 : index
    %14 = vector.load %arg5[%c0_13, %c0_14] : memref<128x128xf32, #tpu.memory_space<vmem>>, vector<128x128xf32>
    tpu.vector_store %arg5[%c0_13, %c0_14], %13 {strides = array<i32>} : memref<128x128xf32, #tpu.memory_space<vmem>>, vector<128x128xf32>,
    return
  }
  func.func @transform_0(%arg0: i32) -> (i32, i32) {
    %c0_i32 = arith.constant 0 : i32
    %c0_i32_0 = arith.constant 0 : i32
    %c0_i32_1 = arith.constant 0 : i32
    return %c0_i32, %c0_i32_0 : i32, i32
  }
  func.func @transform_1(%arg0: i32) -> (i32, i32) {
    %c0_i32 = arith.constant 0 : i32
    %c0_i32_0 = arith.constant 0 : i32
    %c0_i32_1 = arith.constant 0 : i32
    return %c0_i32, %c0_i32_0 : i32, i32
  }
  func.func @transform_2(%arg0: i32) -> (i32, i32) {
    %c0_i32 = arith.constant 0 : i32
    %c0_i32_0 = arith.constant 0 : i32
    %c0_i32_1 = arith.constant 0 : i32
    return %c0_i32, %c0_i32_0 : i32, i32
  }
  func.func @transform_3(%arg0: i32) -> (i32, i32) {
    %c0_i32 = arith.constant 0 : i32
    %c0_i32_0 = arith.constant 0 : i32
    %c0_i32_1 = arith.constant 0 : i32
    return %c0_i32, %c0_i32_0 : i32, i32
  }
  func.func @transform_4(%arg0: i32) -> (i32, i32) {
    %c0_i32 = arith.constant 0 : i32
    %c0_i32_0 = arith.constant 0 : i32
    %c0_i32_1 = arith.constant 0 : i32
    return %c0_i32, %c0_i32_0 : i32, i32
  }
}

</mosaic_0001>

<bundles_post_ra>
// kernel: tpu_custom_call.1
= control target key start
LH: loop header
LB: loop body
LE: loop exit
PB: predicated region body
PF: predicated region fallthrough
CT: control target
= control target key end

     0   :  { %9 = vsyncpa [#allocation3], 0  ;;  %s1328_s0 = inlined_call_operand.hbm [shape: bf16[128,128], index: 0, kind: input, shape index: {}]   ;;  %s1329_s1 = inlined_call_operand.hbm [shape: bf16[128,128], index: 1, kind: input, shape index: {}]   ;;  %s1330_s2 = inlined_call_operand.hbm [shape: bf16[128,128], index: 2, kind: input, shape index: {}]   ;;  %s1331_s3 = inlined_call_operand.hbm [shape: bf16[128,128], index: 3, kind: input, shape index: {}]   ;;  %s1332_s4 = inlined_call_operand.hbm [shape: f32[128,128], index: 4, kind: output, shape index: {}]  }
   0x1   :  { %10 = vsyncpa [#allocation6], 0 }
   0x2   :  { %11 = vsyncpa [#allocation9], 0 }
   0x3   :  { %12 = vsyncpa [#allocation4], 0  ;;  %s1176_s15 = smov [#allocation5]   ;;  %s1177_s17 = smov [#allocation2]  }
   0x4   :  { %s30_s16 = sshll.u32 %s1176_s15, 4  ;;  %s18_s18 = sshll.u32 %s1177_s17, 4  ;;  %s31_s16 = int_to_ptr.vmem [resolvable:$true] %s30_s16  ;;  %s1210_s18 = int_to_ptr.vmem [resolvable:$true] %s18_s18 }
   0x5   :  { %s1058_s21 = scalar_lea.hbm %s1329_s1, 1024 }
   0x6   :  { %p1059_p0 = scmp.ne.s32.totalorder %s1329_s1, %s1058_s21  ;;  %p1062_p1 = scmp.lt.u32.totalorder %s1058_s21, %s1329_s1 }
   0x8   :  { %p1064_p2 = pnand %p1062_p1, %p1059_p0 }
   0xa   :  { %1067 = shalt.err (!%p1064_p2)
}
   0xb   :  { %s1068_s26 = scalar_lea.vmem %s31_s16, 1024  ;;  %p1073_p4 = scmp.lt.s32.totalorder %s31_s16, %s31_s16 }
   0xc   :  { %p1069_p3 = scmp.ne.s32.totalorder %s31_s16, %s1068_s26  ;;  %p1074_p5 = scmp.lt.s32.totalorder %s1068_s26, %s1068_s26 }
   0xe   :  { %p1075_p6 = por %p1074_p5, %p1073_p4 }
  0x10   :  { %p1076_p7 = pnand %p1075_p6, %p1069_p3 }
  0x12   :  { %1079 = shalt.err (!%p1076_p7)
}
  0x13   :  { %s1178_s27 = smov 64   ;;  %s1179_s28 = smov 4  }
  0x14   :  { %36 = dma.hbm_to_vmem [thread:$0]  %s1329_s1, 1024, %s31_s16, [#allocation6], %s1178_s27, %s1178_s27, %s1179_s28  }
  0x15   :  { %s1080_s7 = scalar_lea.hbm %s1328_s0, 1024 }
  0x16   :  { %p1081_p8 = scmp.ne.s32.totalorder %s1328_s0, %s1080_s7  ;;  %p1084_p9 = scmp.lt.u32.totalorder %s1080_s7, %s1328_s0 }
  0x18   :  { %p1086_p10 = pnand %p1084_p9, %p1081_p8 }
  0x1a   :  { %1089 = shalt.err (!%p1086_p10)
}
  0x1b   :  { %s1090_s12 = scalar_lea.vmem %s1210_s18, 1024  ;;  %p1095_p12 = scmp.lt.s32.totalorder %s1210_s18, %s1210_s18 }
  0x1c   :  { %p1091_p11 = scmp.ne.s32.totalorder %s1210_s18, %s1090_s12  ;;  %p1096_p13 = scmp.lt.s32.totalorder %s1090_s12, %s1090_s12 }
  0x1e   :  { %p1097_p0 = por %p1096_p13, %p1095_p12 }
  0x20   :  { %p1098_p1 = pnand %p1097_p0, %p1091_p11 }
  0x22   :  { %1101 = shalt.err (!%p1098_p1)
}
  0x23   :  { %24 = dma.hbm_to_vmem [thread:$0]  %s1328_s0, 1024, %s1210_s18, [#allocation3], %s1178_s27, %s1178_s27, %s1179_s28  }
  0x24   :  { %s1180_s14 = smov [#allocation7]   ;;  %s1181_s16 = smov [#allocation8]  }
  0x25   :  { %s42_s15 = sshll.u32 %s1180_s14, 4  ;;  %s54_s17 = sshll.u32 %s1181_s16, 4  ;;  %s43_s15 = int_to_ptr.vmem [resolvable:$true] %s42_s15  ;;  %s1247_s17 = int_to_ptr.vmem [resolvable:$true] %s54_s17 }
  0x26   :  { %s1102_s21 = scalar_lea.hbm %s1330_s2, 1024 }
  0x27   :  { %p1103_p2 = scmp.ne.s32.totalorder %s1330_s2, %s1102_s21  ;;  %p1106_p3 = scmp.lt.u32.totalorder %s1102_s21, %s1330_s2 }
  0x29   :  { %p1108_p4 = pnand %p1106_p3, %p1103_p2 }
  0x2b   :  { %1111 = shalt.err (!%p1108_p4)
}
  0x2c   :  { %s1112_s0 = scalar_lea.vmem %s43_s15, 1024  ;;  %p1117_p6 = scmp.lt.s32.totalorder %s43_s15, %s43_s15 }
  0x2d   :  { %p1113_p5 = scmp.ne.s32.totalorder %s43_s15, %s1112_s0  ;;  %p1118_p7 = scmp.lt.s32.totalorder %s1112_s0, %s1112_s0 }
  0x2f   :  { %p1119_p8 = por %p1118_p7, %p1117_p6 }
  0x31   :  { %p1120_p9 = pnand %p1119_p8, %p1113_p5 }
  0x33   :  { %1123 = shalt.err (!%p1120_p9)
}
  0x34   :  { %48 = dma.hbm_to_vmem [thread:$0]  %s1330_s2, 1024, %s43_s15, [#allocation6], %s1178_s27, %s1178_s27, %s1179_s28  }
  0x35   :  { %s1124_s5 = scalar_lea.hbm %s1331_s3, 1024 }
  0x36   :  { %p1125_p10 = scmp.ne.s32.totalorder %s1331_s3, %s1124_s5  ;;  %p1128_p11 = scmp.lt.u32.totalorder %s1124_s5, %s1331_s3 }
  0x38   :  { %p1130_p12 = pnand %p1128_p11, %p1125_p10 }
  0x3a   :  { %1133 = shalt.err (!%p1130_p12)
}
  0x3b   :  { %s1134_s10 = scalar_lea.vmem %s1247_s17, 1024  ;;  %p1139_p0 = scmp.lt.s32.totalorder %s1247_s17, %s1247_s17 }
  0x3c   :  { %p1135_p13 = scmp.ne.s32.totalorder %s1247_s17, %s1134_s10  ;;  %p1140_p1 = scmp.lt.s32.totalorder %s1134_s10, %s1134_s10 }
  0x3e   :  { %p1141_p2 = por %p1140_p1, %p1139_p0 }
  0x40   :  { %p1142_p3 = pnand %p1141_p2, %p1135_p13 }
  0x42   :  { %1145 = shalt.err (!%p1142_p3)
}
  0x43   :  { %60 = dma.hbm_to_vmem [thread:$0]  %s1331_s3, 1024, %s1247_s17, [#allocation9], %s1178_s27, %s1178_s27, %s1179_s28  }
  0x44   :  { %1168 = dma.done.wait [#allocation3], 1024  }
  0x45   :  { %1169 = vsyncadd [#allocation3], 4294966272 }
  0x46   :  { %1170 = dma.done.wait [#allocation6], 2048  }
  0x47   :  { %1171 = vsyncadd [#allocation6], 4294965248 }
  0x48   :  { %1172 = dma.done.wait [#allocation9], 1024  }
  0x49   :  { %1173 = vsyncadd [#allocation9], 4294966272  ;;  %v1026_v0 = vld [vmem:[#allocation7] sm:$0xff]   ;;  %v1027_v1 = vld [vmem:[#allocation7 + $0x8] sm:$0xff]   ;;  %s1182_s3 = smov [#allocation10]  }
  0x4a   :  { %889 = vmatprep.subr.bf16.mxu0 %v1026_v0  ;;  %v1028_v2 = vld [vmem:[#allocation7 + $0x10] sm:$0xff]   ;;  %v1029_v3 = vld [vmem:[#allocation7 + $0x18] sm:$0xff]   ;;  %v1034_v4 = vld [vmem:[#allocation5] sm:$0xff]   ;;  %s779_s27 = sshll.u32 %s1182_s3, 4  ;;  %s780_s27 = int_to_ptr.vmem [resolvable:$true] %s779_s27 }
  0x4b   :  { %890 = vmatpush3.bf16.msra.mxu0 %v1026_v0  ;;  %905 = vmatprep.mubr.bf16.mxu0 %v1034_v4  ;;  %v1030_v5 = vld [vmem:[#allocation7 + $0x20] sm:$0xff]   ;;  %v1031_v6 = vld [vmem:[#allocation7 + $0x28] sm:$0xff]   ;;  %v1032_v7 = vld [vmem:[#allocation7 + $0x30] sm:$0xff]   ;;  %s1146_s28 = scalar_lea.vmem %s780_s27, 2048  ;;  %p1151_p5 = scmp.lt.s32.totalorder %s780_s27, %s780_s27 }
  0x4c   :  { %891 = vmatprep.subr.bf16.mxu0 %v1027_v1  ;;  %v1033_v8 = vld [vmem:[#allocation7 + $0x38] sm:$0xff]   ;;  %v1035_v9 = vld [vmem:[#allocation5 + $0x8] sm:$0xff]   ;;  %v1036_v10 = vld [vmem:[#allocation5 + $0x10] sm:$0xff]   ;;  %p1147_p4 = scmp.ne.s32.totalorder %s780_s27, %s1146_s28  ;;  %p1152_p6 = scmp.lt.s32.totalorder %s1146_s28, %s1146_s28 }
  0x4d   :  { %v1037_v11 = vld [vmem:[#allocation5 + $0x18] sm:$0xff]   ;;  %v1038_v12 = vld [vmem:[#allocation5 + $0x20] sm:$0xff]   ;;  %v1039_v13 = vld [vmem:[#allocation5 + $0x28] sm:$0xff]  }
  0x4e   :  { %v1040_v14 = vld [vmem:[#allocation5 + $0x30] sm:$0xff]   ;;  %v1041_v15 = vld [vmem:[#allocation5 + $0x38] sm:$0xff]   ;;  %v1284_v16 = vld [vmem:[#allocation2] sm:$0xff]   ;;  %p1153_p7 = por %p1152_p6, %p1151_p5 }
  0x4f   :  { %892 = vmatpush3.bf16.msra.mxu0 %v1027_v1  ;;  %937 = vmatprep.mubr.bf16.mxu1 %v1284_v16  ;;  %v1050_v17 = vld [vmem:[#allocation8] sm:$0xff]   ;;  %v1051_v18 = vld [vmem:[#allocation8 + $0x8] sm:$0xff]   ;;  %v1052_v19 = vld [vmem:[#allocation8 + $0x10] sm:$0xff]  }
  0x50   :  { %893 = vmatprep.subr.bf16.mxu0 %v1028_v2  ;;  %v1053_v20 = vld [vmem:[#allocation8 + $0x18] sm:$0xff]   ;;  %v1054_v21 = vld [vmem:[#allocation8 + $0x20] sm:$0xff]   ;;  %v1055_v22 = vld [vmem:[#allocation8 + $0x28] sm:$0xff]   ;;  %p1154_p8 = pnand %p1153_p7, %p1147_p4 }
  0x51   :  { %v1287_v47 = vld [vmem:[#allocation2 + $0x8] sm:$0xff]   ;;  %v1289_v48 = vld [vmem:[#allocation2 + $0x10] sm:$0xff]   ;;  %v1293_v49 = vld [vmem:[#allocation2 + $0x18] sm:$0xff]  }
  0x52   :  { %v1295_v50 = vld [vmem:[#allocation2 + $0x20] sm:$0xff]   ;;  %v1299_v51 = vld [vmem:[#allocation2 + $0x28] sm:$0xff]   ;;  %v1301_v52 = vld [vmem:[#allocation2 + $0x30] sm:$0xff]  }
  0x53   :  { %894 = vmatpush3.bf16.msra.mxu0 %v1028_v2  ;;  %v1305_v53 = vld [vmem:[#allocation2 + $0x38] sm:$0xff]   ;;  %v1056_v54 = vld [vmem:[#allocation8 + $0x30] sm:$0xff]  }
  0x54   :  { %895 = vmatprep.subr.bf16.mxu0 %v1029_v3  ;;  %v1057_v55 = vld [vmem:[#allocation8 + $0x38] sm:$0xff]  }
  0x57   :  { %896 = vmatpush3.bf16.msra.mxu0 %v1029_v3 }
  0x58   :  { %897 = vmatprep.subr.bf16.mxu0 %v1030_v5 }
  0x5b   :  { %898 = vmatpush3.bf16.msra.mxu0 %v1030_v5 }
  0x5c   :  { %899 = vmatprep.subr.bf16.mxu0 %v1031_v6 }
  0x5f   :  { %900 = vmatpush3.bf16.msra.mxu0 %v1031_v6 }
  0x60   :  { %901 = vmatprep.subr.bf16.mxu0 %v1032_v7 }
  0x63   :  { %902 = vmatpush3.bf16.msra.mxu0 %v1032_v7 }
  0x64   :  { %903 = vmatprep.subr.bf16.mxu0 %v1033_v8 }
  0x67   :  { %904 = vmatpush3.bf16.msra.mxu0 %v1033_v8 }
  0x68   :  { %953 = vmatprep.subr.bf16.mxu0 %v1050_v17 }
  0x6a   :  { %906 = vmatmul.mubr.bf16.vlgmr.msra.gmra.mrb[0].mxu0 %v1035_v9 }
  0x6b   :  { %909 = vmatprep.mubr.bf16.mxu0 %v1036_v10  ;;  %954 = vmatpush3.bf16.msra.mxu0 %v1050_v17 }
  0x6c   :  { %955 = vmatprep.subr.bf16.mxu0 %v1051_v18 }
  0x6f   :  { %956 = vmatpush3.bf16.msra.mxu0 %v1051_v18 }
  0x70   :  { %957 = vmatprep.subr.bf16.mxu0 %v1052_v19 }
  0x72   :  { %910 = vmatmul.mubr.bf16.gmra.mrb[4].mxu0 %v1037_v11 }
  0x73   :  { %913 = vmatprep.mubr.bf16.mxu0 %v1038_v12  ;;  %958 = vmatpush3.bf16.msra.mxu0 %v1052_v19 }
  0x74   :  { %959 = vmatprep.subr.bf16.mxu0 %v1053_v20 }
  0x77   :  { %960 = vmatpush3.bf16.msra.mxu0 %v1053_v20 }
  0x78   :  { %961 = vmatprep.subr.bf16.mxu0 %v1054_v21 }
  0x7a   :  { %914 = vmatmul.mubr.bf16.gmra.mrb[8].mxu0 %v1039_v13 }
  0x7b   :  { %917 = vmatprep.mubr.bf16.mxu0 %v1040_v14  ;;  %962 = vmatpush3.bf16.msra.mxu0 %v1054_v21 }
  0x7c   :  { %963 = vmatprep.subr.bf16.mxu0 %v1055_v22 }
  0x7f   :  { %964 = vmatpush3.bf16.msra.mxu0 %v1055_v22 }
  0x80   :  { %965 = vmatprep.subr.bf16.mxu0 %v1056_v54 }
  0x82   :  { %918 = vmatmul.mubr.bf16.gmra.mrb[12].mxu0 %v1041_v15 }
  0x83   :  { %966 = vmatpush3.bf16.msra.mxu0 %v1056_v54 }
  0x84   :  { %967 = vmatprep.subr.bf16.mxu0 %v1057_v55 }
  0x87   :  { %968 = vmatpush3.bf16.msra.mxu0 %v1057_v55 }
 0x13d   :  { %v907_v23 = vpop.f32.mrb[0].mxu0 }
 0x13e   :  { %v236_v24 = vpop.f32.mrb[1].mxu0 }
 0x13f   :  { %v908_v25 = vpop.f32.mrb[2].mxu0 }
 0x140   :  { %v316_v26 = vpack.c.bf16 %v908_v25, %v907_v23  ;;  %v239_v27 = vpop.f32.mrb[3].mxu0 }
 0x141   :  { %v315_v28 = vpack.c.bf16 %v239_v27, %v236_v24 }
 0x143   :  { %921 = vmatprep.subr.bf16.mxu1 %v315_v28 }
 0x144   :  { %922 = vmatpush3.bf16.msra.mxu1 %v315_v28 }
 0x145   :  { %v911_v29 = vpop.f32.mrb[4].mxu0  ;;  %923 = vmatprep.subr.bf16.mxu1 %v316_v26 }
 0x146   :  { %v252_v30 = vpop.f32.mrb[5].mxu0 }
 0x147   :  { %v912_v31 = vpop.f32.mrb[6].mxu0 }
 0x148   :  { %v318_v32 = vpack.c.bf16 %v912_v31, %v911_v29  ;;  %v255_v33 = vpop.f32.mrb[7].mxu0  ;;  %924 = vmatpush3.bf16.msra.mxu1 %v316_v26 }
 0x149   :  { %v317_v34 = vpack.c.bf16 %v255_v33, %v252_v30 }
 0x14b   :  { %925 = vmatprep.subr.bf16.mxu1 %v317_v34 }
 0x14c   :  { %926 = vmatpush3.bf16.msra.mxu1 %v317_v34 }
 0x14d   :  { %v915_v35 = vpop.f32.mrb[8].mxu0  ;;  %927 = vmatprep.subr.bf16.mxu1 %v318_v32 }
 0x14e   :  { %v268_v36 = vpop.f32.mrb[9].mxu0 }
 0x14f   :  { %v916_v37 = vpop.f32.mrb[10].mxu0 }
 0x150   :  { %v320_v38 = vpack.c.bf16 %v916_v37, %v915_v35  ;;  %v271_v39 = vpop.f32.mrb[11].mxu0  ;;  %928 = vmatpush3.bf16.msra.mxu1 %v318_v32 }
 0x151   :  { %v319_v40 = vpack.c.bf16 %v271_v39, %v268_v36 }
 0x153   :  { %929 = vmatprep.subr.bf16.mxu1 %v319_v40 }
 0x154   :  { %930 = vmatpush3.bf16.msra.mxu1 %v319_v40 }
 0x155   :  { %v919_v41 = vpop.f32.mrb[12].mxu0  ;;  %931 = vmatprep.subr.bf16.mxu1 %v320_v38 }
 0x156   :  { %v284_v42 = vpop.f32.mrb[13].mxu0 }
 0x157   :  { %v920_v43 = vpop.f32.mrb[14].mxu0 }
 0x158   :  { %v322_v44 = vpack.c.bf16 %v920_v43, %v919_v41  ;;  %v287_v45 = vpop.f32.mrb[15].mxu0  ;;  %932 = vmatpush3.bf16.msra.mxu1 %v320_v38 }
 0x159   :  { %v321_v46 = vpack.c.bf16 %v287_v45, %v284_v42 }
 0x15b   :  { %933 = vmatprep.subr.bf16.mxu1 %v321_v46 }
 0x15c   :  { %934 = vmatpush3.bf16.msra.mxu1 %v321_v46 }
 0x15d   :  { %935 = vmatprep.subr.bf16.mxu1 %v322_v44 }
 0x160   :  { %936 = vmatpush3.bf16.msra.mxu1 %v322_v44 }
 0x163   :  { %938 = vmatmul.mubr.bf16.vlgmr.msra.gmra.mrb[0].mxu1 %v1287_v47 }
 0x164   :  { %941 = vmatprep.mubr.bf16.mxu1 %v1289_v48 }
 0x16b   :  { %942 = vmatmul.mubr.bf16.gmra.mrb[4].mxu1 %v1293_v49 }
 0x16c   :  { %945 = vmatprep.mubr.bf16.mxu1 %v1295_v50 }
 0x173   :  { %946 = vmatmul.mubr.bf16.gmra.mrb[8].mxu1 %v1299_v51 }
 0x174   :  { %949 = vmatprep.mubr.bf16.mxu1 %v1301_v52 }
 0x17b   :  { %950 = vmatmul.mubr.bf16.gmra.mrb[12].mxu1 %v1305_v53 }
 0x17c   :  { %1001 = vmatprep.mubr.bf16.mxu1 %v1284_v16 }
 0x236   :  { %v939_v56 = vpop.f32.mrb[0].mxu1 }
 0x237   :  { %v405_v57 = vpop.f32.mrb[1].mxu1  ;;  %v470_v59 = vmax.f32 %v939_v56, 0.0 }
 0x238   :  { %v940_v58 = vpop.f32.mrb[2].mxu1  ;;  %v468_v62 = vmax.f32 %v405_v57, 0.0 }
 0x239   :  { %v471_v60 = vmax.f32 %v940_v58, 0.0  ;;  %v408_v61 = vpop.f32.mrb[3].mxu1 }
 0x23a   :  { %v469_v63 = vmax.f32 %v408_v61, 0.0 }
 0x23b   :  { %v485_v0 = vpack.c.bf16 %v471_v60, %v470_v59 }
 0x23c   :  { %v484_v1 = vpack.c.bf16 %v469_v63, %v468_v62 }
 0x23e   :  { %v943_v2 = vpop.f32.mrb[4].mxu1  ;;  %969 = vmatprep.mubr.bf16.mxu0 %v484_v1 }
 0x23f   :  { %v421_v3 = vpop.f32.mrb[5].mxu1  ;;  %970 = vmatmul.mubr.bf16.vlgmr.msra.gmra.mrb[16].mxu0 %v485_v0  ;;  %v474_v5 = vmax.f32 %v943_v2, 0.0 }
 0x240   :  { %v944_v4 = vpop.f32.mrb[6].mxu1  ;;  %v472_v8 = vmax.f32 %v421_v3, 0.0 }
 0x241   :  { %v475_v6 = vmax.f32 %v944_v4, 0.0  ;;  %v424_v7 = vpop.f32.mrb[7].mxu1 }
 0x242   :  { %v473_v9 = vmax.f32 %v424_v7, 0.0 }
 0x243   :  { %v487_v10 = vpack.c.bf16 %v475_v6, %v474_v5 }
 0x244   :  { %v486_v11 = vpack.c.bf16 %v473_v9, %v472_v8 }
 0x246   :  { %v947_v12 = vpop.f32.mrb[8].mxu1  ;;  %973 = vmatprep.mubr.bf16.mxu0 %v486_v11 }
 0x247   :  { %v437_v13 = vpop.f32.mrb[9].mxu1  ;;  %974 = vmatmul.mubr.bf16.gmra.mrb[20].mxu0 %v487_v10  ;;  %v478_v15 = vmax.f32 %v947_v12, 0.0 }
 0x248   :  { %v948_v14 = vpop.f32.mrb[10].mxu1  ;;  %v476_v18 = vmax.f32 %v437_v13, 0.0 }
 0x249   :  { %v479_v16 = vmax.f32 %v948_v14, 0.0  ;;  %v440_v17 = vpop.f32.mrb[11].mxu1 }
 0x24a   :  { %v477_v19 = vmax.f32 %v440_v17, 0.0 }
 0x24b   :  { %v489_v20 = vpack.c.bf16 %v479_v16, %v478_v15 }
 0x24c   :  { %v488_v21 = vpack.c.bf16 %v477_v19, %v476_v18 }
 0x24e   :  { %v951_v22 = vpop.f32.mrb[12].mxu1  ;;  %977 = vmatprep.mubr.bf16.mxu0 %v488_v21 }
 0x24f   :  { %v453_v23 = vpop.f32.mrb[13].mxu1  ;;  %978 = vmatmul.mubr.bf16.gmra.mrb[24].mxu0 %v489_v20  ;;  %v482_v25 = vmax.f32 %v951_v22, 0.0 }
 0x250   :  { %v952_v24 = vpop.f32.mrb[14].mxu1  ;;  %v480_v28 = vmax.f32 %v453_v23, 0.0 }
 0x251   :  { %v483_v26 = vmax.f32 %v952_v24, 0.0  ;;  %v456_v27 = vpop.f32.mrb[15].mxu1 }
 0x252   :  { %v481_v29 = vmax.f32 %v456_v27, 0.0 }
 0x253   :  { %v491_v30 = vpack.c.bf16 %v483_v26, %v482_v25 }
 0x254   :  { %v490_v31 = vpack.c.bf16 %v481_v29, %v480_v28 }
 0x256   :  { %981 = vmatprep.mubr.bf16.mxu0 %v490_v31 }
 0x257   :  { %982 = vmatmul.mubr.bf16.gmra.mrb[28].mxu0 %v491_v30 }
 0x312   :  { %v971_v32 = vpop.f32.mrb[16].mxu0 }
 0x313   :  { %v590_v33 = vpop.f32.mrb[17].mxu0 }
 0x314   :  { %v972_v34 = vpop.f32.mrb[18].mxu0 }
 0x315   :  { %v654_v35 = vpack.c.bf16 %v972_v34, %v971_v32  ;;  %v593_v36 = vpop.f32.mrb[19].mxu0 }
 0x316   :  { %v653_v37 = vpack.c.bf16 %v593_v36, %v590_v33 }
 0x318   :  { %985 = vmatprep.subr.bf16.mxu1 %v653_v37 }
 0x319   :  { %986 = vmatpush3.bf16.msra.mxu1 %v653_v37 }
 0x31a   :  { %v975_v38 = vpop.f32.mrb[20].mxu0  ;;  %987 = vmatprep.subr.bf16.mxu1 %v654_v35 }
 0x31b   :  { %v606_v39 = vpop.f32.mrb[21].mxu0 }
 0x31c   :  { %v976_v40 = vpop.f32.mrb[22].mxu0 }
 0x31d   :  { %v656_v41 = vpack.c.bf16 %v976_v40, %v975_v38  ;;  %v609_v42 = vpop.f32.mrb[23].mxu0  ;;  %988 = vmatpush3.bf16.msra.mxu1 %v654_v35 }
 0x31e   :  { %v655_v43 = vpack.c.bf16 %v609_v42, %v606_v39 }
 0x320   :  { %989 = vmatprep.subr.bf16.mxu1 %v655_v43 }
 0x321   :  { %990 = vmatpush3.bf16.msra.mxu1 %v655_v43 }
 0x322   :  { %v979_v44 = vpop.f32.mrb[24].mxu0  ;;  %991 = vmatprep.subr.bf16.mxu1 %v656_v41 }
 0x323   :  { %v622_v45 = vpop.f32.mrb[25].mxu0 }
 0x324   :  { %v980_v46 = vpop.f32.mrb[26].mxu0 }
 0x325   :  { %v658_v54 = vpack.c.bf16 %v980_v46, %v979_v44  ;;  %v625_v55 = vpop.f32.mrb[27].mxu0  ;;  %992 = vmatpush3.bf16.msra.mxu1 %v656_v41 }
 0x326   :  { %v657_v56 = vpack.c.bf16 %v625_v55, %v622_v45 }
 0x328   :  { %993 = vmatprep.subr.bf16.mxu1 %v657_v56 }
 0x329   :  { %994 = vmatpush3.bf16.msra.mxu1 %v657_v56 }
 0x32a   :  { %v983_v57 = vpop.f32.mrb[28].mxu0  ;;  %995 = vmatprep.subr.bf16.mxu1 %v658_v54 }
 0x32b   :  { %v638_v58 = vpop.f32.mrb[29].mxu0 }
 0x32c   :  { %v984_v59 = vpop.f32.mrb[30].mxu0 }
 0x32d   :  { %v660_v60 = vpack.c.bf16 %v984_v59, %v983_v57  ;;  %v641_v61 = vpop.f32.mrb[31].mxu0  ;;  %996 = vmatpush3.bf16.msra.mxu1 %v658_v54 }
 0x32e   :  { %v659_v62 = vpack.c.bf16 %v641_v61, %v638_v58 }
 0x330   :  { %997 = vmatprep.subr.bf16.mxu1 %v659_v62 }
 0x331   :  { %998 = vmatpush3.bf16.msra.mxu1 %v659_v62 }
 0x332   :  { %999 = vmatprep.subr.bf16.mxu1 %v660_v60 }
 0x335   :  { %1000 = vmatpush3.bf16.msra.mxu1 %v660_v60 }
 0x338   :  { %1002 = vmatmul.mubr.bf16.vlgmr.msra.gmra.mrb[16].mxu1 %v1287_v47 }
 0x339   :  { %1005 = vmatprep.mubr.bf16.mxu1 %v1289_v48 }
 0x340   :  { %1006 = vmatmul.mubr.bf16.gmra.mrb[20].mxu1 %v1293_v49 }
 0x341   :  { %1009 = vmatprep.mubr.bf16.mxu1 %v1295_v50 }
 0x348   :  { %1010 = vmatmul.mubr.bf16.gmra.mrb[24].mxu1 %v1299_v51 }
 0x349   :  { %1013 = vmatprep.mubr.bf16.mxu1 %v1301_v52 }
 0x350   :  { %1014 = vmatmul.mubr.bf16.gmra.mrb[28].mxu1 %v1305_v53 }
 0x40b   :  { %v1003_v63 = vpop.f32.mrb[16].mxu1 }
 0x40c   :  { %760 = vst [vmem:[#allocation10 + $0x10] sm:$0xff] %v1003_v63  ;;  %v695_v0 = vpop.f32.mrb[17].mxu1 }
 0x40d   :  { %758 = vst [vmem:[#allocation10] sm:$0xff] %v695_v0  ;;  %v1004_v1 = vpop.f32.mrb[18].mxu1 }
 0x40e   :  { %761 = vst [vmem:[#allocation10 + $0x18] sm:$0xff] %v1004_v1  ;;  %v698_v2 = vpop.f32.mrb[19].mxu1 }
 0x40f   :  { %759 = vst [vmem:[#allocation10 + $0x8] sm:$0xff] %v698_v2 }
 0x413   :  { %v1007_v47 = vpop.f32.mrb[20].mxu1 }
 0x414   :  { %764 = vst [vmem:[#allocation10 + $0x30] sm:$0xff] %v1007_v47  ;;  %v711_v48 = vpop.f32.mrb[21].mxu1 }
 0x415   :  { %762 = vst [vmem:[#allocation10 + $0x20] sm:$0xff] %v711_v48  ;;  %v1008_v49 = vpop.f32.mrb[22].mxu1 }
 0x416   :  { %765 = vst [vmem:[#allocation10 + $0x38] sm:$0xff] %v1008_v49  ;;  %v714_v50 = vpop.f32.mrb[23].mxu1 }
 0x417   :  { %763 = vst [vmem:[#allocation10 + $0x28] sm:$0xff] %v714_v50 }
 0x41b   :  { %v1011_v51 = vpop.f32.mrb[24].mxu1 }
 0x41c   :  { %768 = vst [vmem:[#allocation10 + $0x50] sm:$0xff] %v1011_v51  ;;  %v727_v52 = vpop.f32.mrb[25].mxu1 }
 0x41d   :  { %766 = vst [vmem:[#allocation10 + $0x40] sm:$0xff] %v727_v52  ;;  %v1012_v53 = vpop.f32.mrb[26].mxu1 }
 0x41e   :  { %769 = vst [vmem:[#allocation10 + $0x58] sm:$0xff] %v1012_v53  ;;  %v730_v3 = vpop.f32.mrb[27].mxu1 }
 0x41f   :  { %767 = vst [vmem:[#allocation10 + $0x48] sm:$0xff] %v730_v3 }
 0x423   :  { %v1015_v4 = vpop.f32.mrb[28].mxu1 }
 0x424   :  { %772 = vst [vmem:[#allocation10 + $0x70] sm:$0xff] %v1015_v4  ;;  %v743_v5 = vpop.f32.mrb[29].mxu1 }
 0x425   :  { %770 = vst [vmem:[#allocation10 + $0x60] sm:$0xff] %v743_v5  ;;  %v1016_v6 = vpop.f32.mrb[30].mxu1 }
 0x426   :  { %773 = vst [vmem:[#allocation10 + $0x78] sm:$0xff] %v1016_v6  ;;  %v746_v7 = vpop.f32.mrb[31].mxu1 }
 0x427   :  { %771 = vst [vmem:[#allocation10 + $0x68] sm:$0xff] %v746_v7 }
 0x428   :  { %1157 = shalt.err (!%p1154_p8)
}
 0x429   :  { %s1158_s13 = scalar_lea.hbm %s1332_s4, 2048 }
 0x42a   :  { %p1159_p9 = scmp.ne.s32.totalorder %s1332_s4, %s1158_s13  ;;  %p1162_p10 = scmp.lt.u32.totalorder %s1158_s13, %s1332_s4 }
 0x42c   :  { %p1164_p11 = pnand %p1162_p10, %p1159_p9 }
 0x42e   :  { %1167 = shalt.err (!%p1164_p11)
}
 0x42f   :  { %s1183_s19 = smov 128   ;;  %s1184_s20 = smov 8  }
 0x430   :  { %785 = dma.vmem_to_hbm [thread:$0]  %s780_s27, 2048, %s1332_s4, [#allocation4], %s1183_s19, %s1183_s19, %s1184_s20  }
 0x431   :  { %1174 = dma.done.wait [#allocation4], 2048  }
 0x432   :  { %1175 = vsyncadd [#allocation4], 4294965248 }
 0x433   :  { %789 = vsyncpa [#allocation3], 1 }
 0x434   :  { %790 = vsyncpa [#allocation6], 1 }
 0x435   :  { %791 = vsyncpa [#allocation9], 1 }
 0x436   :  { %792 = vsyncpa [#allocation4], 1 }

</bundles_post_ra>
